<compile_context>
chip_gen: v7x
topology: tpu7x:2x2x1
jax: 0.10.0
libtpu: 0.0.40
codegen_flags: <defaults>
</compile_context>

<pallas_src>
import jax
import jax.numpy as jnp
from jax.experimental import pallas as pl
from jax.experimental.pallas import tpu as pltpu


def mlp_kernel(x_ref, *refs):
    """refs = (w_1, b_1, ..., w_n, b_n, o_ref): fused affine chain on one batch tile."""
    o_ref = refs[-1]
    wb = refs[:-1]
    n_layers = len(wb) // 2
    cdt = wb[0].dtype                              # MXU operand dtype (bf16 by default)

    h = x_ref[...].astype(cdt)
    for i in range(n_layers):
        w_ref, b_ref = wb[2 * i], wb[2 * i + 1]
        # MXU matmul in the operand dtype, f32 accumulation, bias add on the f32 value.
        h = (jnp.dot(h, w_ref[...], preferred_element_type=jnp.float32)
             + b_ref[...].astype(jnp.float32))
        if i + 1 < n_layers:
            h = h.astype(cdt)                      # next layer's MXU operand
    o_ref[...] = h.astype(o_ref.dtype)


def _round_up(x, m):
    return (x + m - 1) // m * m


def _vmem_budget_bytes():
    """~13/16 of physical VMEM: ≈56 MiB on v7x, ≈104 MiB on v5e/v6e (headroom kept)."""
    try:
        cap = int(pltpu.get_tpu_info().vmem_capacity_bytes)
    except Exception:
        cap = 128 << 20
    return cap * 13 // 16


def mlp_forward(x, params, *, fold=True, tm=None, compute_dtype=jnp.bfloat16):
    """x: [batch, dim]; params: list of (W [dim_in, dim_out], b [1, dim_out]) pairs.

    W is stored transposed relative to PyTorch's nn.Linear.weight, i.e. y = x @ W + b.
    """
    batch, dim = x.shape
    out_dtype = x.dtype

    # --- algebraic fold of the activation-free chain into one affine map (f32) ----
    if fold and len(params) > 1:
        wc = params[0][0].astype(jnp.float32)
        bc = params[0][1].astype(jnp.float32)
        for (w, b) in params[1:]:
            w32 = w.astype(jnp.float32)
            wc = wc @ w32
            bc = bc @ w32 + b.astype(jnp.float32)
        params = [(wc, bc)]

    # --- cast MXU operands once (weights + x) to the compute dtype; biases stay f32 -
    pairs = [(w.astype(compute_dtype), b.astype(jnp.float32)) for (w, b) in params]
    x_c = x.astype(compute_dtype)

    budget = _vmem_budget_bytes()
    align = 16 if jnp.dtype(compute_dtype).itemsize < 4 else 8

    if tm is None:
        tm = 512 if budget >= (96 << 20) else 256
        # On small-VMEM parts (v7x: 2 TCs, 64 MiB) keep >= 2 grid tiles when possible.
        if budget < (96 << 20) and batch >= 2 * align:
            tm = min(tm, _round_up(pl.cdiv(batch, 2), align))
    tm = max(align, min(_round_up(tm, align), _round_up(batch, align)))

    padded = _round_up(batch, tm)
    if padded != batch:
        x_c = jnp.pad(x_c, ((0, padded - batch), (0, 0)))
    n_tiles = padded // tm

    flat = []
    in_specs = [pl.BlockSpec((tm, dim), lambda i: (i, 0))]          # x: batch-tiled
    resident_bytes = 0
    for (w, b) in pairs:
        flat.extend([w, b])
        # Constant block index -> keep resident, single-buffered (no pointless 2x VMEM).
        in_specs.append(pl.BlockSpec(w.shape, lambda i: (0, 0),
                                     pipeline_mode=pl.Buffered(1)))
        in_specs.append(pl.BlockSpec(b.shape, lambda i: (0, 0),
                                     pipeline_mode=pl.Buffered(1)))
        resident_bytes += w.size * w.dtype.itemsize + b.size * b.dtype.itemsize

    # Footprint: resident weights/biases + double-buffered x/out tiles + margin.
    io_bytes = 2 * tm * dim * (x_c.dtype.itemsize + jnp.dtype(out_dtype).itemsize)
    vmem_limit = int(min(resident_bytes + io_bytes + (4 << 20), budget))

    out = pl.pallas_call(
        mlp_kernel,
        out_shape=jax.ShapeDtypeStruct((padded, dim), out_dtype),
        grid_spec=pltpu.PrefetchScalarGridSpec(
            num_scalar_prefetch=0,
            grid=(n_tiles,),
            in_specs=in_specs,
            out_specs=pl.BlockSpec((tm, dim), lambda i: (i, 0)),
        ),
        compiler_params=pltpu.CompilerParams(
            dimension_semantics=("parallel",),
            vmem_limit_bytes=vmem_limit,
        ),
    )(x_c, *flat)

    if padded != batch:
        out = out[:batch]
    return out


def mlp_reference(x, params):
    h = x.astype(jnp.float32)
    for (w, b) in params:
        h = h @ w.astype(jnp.float32) + b.astype(jnp.float32)
    return h.astype(x.dtype)


if __name__ == "__main__":
    # dim = 128: lane-dense output stores; batch = 40: exercises the padded-tile path.
    batch, dim = 40, 128
    key = jax.random.PRNGKey(0)
    kx, *kps = jax.random.split(key, 1 + 8)

    x = jax.random.normal(kx, (batch, dim), dtype=jnp.float32)

    # nn.Linear(dim, dim) params: weight [out, in] stored transposed as [in, out],
    # bias [dim] -> [1, dim]; Uniform(-1/sqrt(dim), 1/sqrt(dim)) ~ PyTorch default init.
    scale = 1.0 / float(dim) ** 0.5
    params = []
    for i in range(4):
        w = jax.random.uniform(kps[2 * i], (dim, dim), jnp.float32,
                               minval=-scale, maxval=scale)
        b = jax.random.uniform(kps[2 * i + 1], (1, dim), jnp.float32,
                               minval=-scale, maxval=scale)
        params.append((w, b))

    ref = mlp_reference(x, params)

    # Folded path (default): one dot + bias per tile.  tm=16 -> 3-step grid pipeline.
    out = jax.block_until_ready(mlp_forward(x, params, tm=16))
    assert out.shape == (batch, dim)
    # bf16 MXU operands + layer fold change rounding slightly vs the f32 reference.
    assert jnp.allclose(out, ref, atol=3e-2, rtol=3e-2), "folded kernel mismatch"

    # Unfolded 4-layer fused kernel (same semantics; for weight-updating use cases).
    out4 = jax.block_until_ready(mlp_forward(x, params, fold=False, tm=16))
    assert jnp.allclose(out4, ref, atol=3e-2, rtol=3e-2), "fused 4-layer kernel mismatch"

    print("KERNEL_OK")
</pallas_src>

<mosaic_0001>
module attributes {stable_mosaic.version = 11 : i64} {
  func.func @mlp_kernel(%arg0: i32, %arg1: memref<16x128xbf16, #tpu.memory_space<vmem>>, %arg2: memref<128x128xbf16, #tpu.memory_space<vmem>>, %arg3: memref<1x128xf32, #tpu.memory_space<vmem>>, %arg4: memref<16x128xf32, #tpu.memory_space<vmem>>) attributes {dimension_semantics = [#tpu.dimension_semantics<parallel>], iteration_bounds = array<i64: 3>, scalar_prefetch = 0 : i64, scratch_operands = 0 : i64, tpu.core_type = #tpu.core_type<tc>, window_params = [{transform_indices = @transform_0, window_bounds = array<i64: 16, 128>}, {pipeline_mode = #tpu.pipeline_mode<synchronous>, transform_indices = @transform_1, window_bounds = array<i64: 128, 128>}, {pipeline_mode = #tpu.pipeline_mode<synchronous>, transform_indices = @transform_2, window_bounds = array<i64: 1, 128>}, {transform_indices = @transform_3, window_bounds = array<i64: 16, 128>}]} {
    %c0 = arith.constant 0 : index
    %c0_0 = arith.constant 0 : index
    %0 = vector.load %arg1[%c0, %c0_0] : memref<16x128xbf16, #tpu.memory_space<vmem>>, vector<16x128xbf16>
    %c0_1 = arith.constant 0 : index
    %c0_2 = arith.constant 0 : index
    %1 = vector.load %arg2[%c0_1, %c0_2] : memref<128x128xbf16, #tpu.memory_space<vmem>>, vector<128x128xbf16>
    %cst = arith.constant dense<0.000000e+00> : vector<16x128xf32>
    %2 = tpu.matmul %0, %1, %cst {dimension_numbers = #tpu.dot_dimension_numbers<[1], [0], [0], [1], [0, 0, 1, 1], [], []>} : vector<16x128xbf16>, vector<128x128xbf16>, vector<16x128xf32> -> vector<16x128xf32>
    %c0_3 = arith.constant 0 : index
    %c0_4 = arith.constant 0 : index
    %3 = vector.load %arg3[%c0_3, %c0_4] : memref<1x128xf32, #tpu.memory_space<vmem>>, vector<1x128xf32>
    %4 = vector.broadcast %3 : vector<1x128xf32> to vector<16x128xf32>
    %5 = arith.addf %2, %4 : vector<16x128xf32>
    %c0_5 = arith.constant 0 : index
    %c0_6 = arith.constant 0 : index
    %6 = vector.load %arg4[%c0_5, %c0_6] : memref<16x128xf32, #tpu.memory_space<vmem>>, vector<16x128xf32>
    tpu.vector_store %arg4[%c0_5, %c0_6], %5 {strides = array<i32>} : memref<16x128xf32, #tpu.memory_space<vmem>>, vector<16x128xf32>,
    return
  }
  func.func @transform_0(%arg0: i32) -> (i32, i32) {
    %c0_i32 = arith.constant 0 : i32
    %c0_i32_0 = arith.constant 0 : i32
    return %arg0, %c0_i32 : i32, i32
  }
  func.func @transform_1(%arg0: i32) -> (i32, i32) {
    %c0_i32 = arith.constant 0 : i32
    %c0_i32_0 = arith.constant 0 : i32
    %c0_i32_1 = arith.constant 0 : i32
    return %c0_i32, %c0_i32_0 : i32, i32
  }
  func.func @transform_2(%arg0: i32) -> (i32, i32) {
    %c0_i32 = arith.constant 0 : i32
    %c0_i32_0 = arith.constant 0 : i32
    %c0_i32_1 = arith.constant 0 : i32
    return %c0_i32, %c0_i32_0 : i32, i32
  }
  func.func @transform_3(%arg0: i32) -> (i32, i32) {
    %c0_i32 = arith.constant 0 : i32
    %c0_i32_0 = arith.constant 0 : i32
    return %arg0, %c0_i32 : i32, i32
  }
}

</mosaic_0001>

<bundles_post_ra>
// kernel: tpu_custom_call.1
= control target key start
LH: loop header
LB: loop body
LE: loop exit
PB: predicated region body
PF: predicated region fallthrough
CT: control target
= control target key end

     0   :  { %8 = vsyncpa [#allocation3], 0  ;;  %s919_s0 = inlined_call_operand.hbm [shape: bf16[48,128], index: 0, kind: input, shape index: {}]   ;;  %s920_s1 = inlined_call_operand.hbm [shape: bf16[128,128], index: 1, kind: input, shape index: {}]   ;;  %s921_s2 = inlined_call_operand.vmem [shape: f32[1,128], index: 2, kind: input, shape index: {}]   ;;  %s922_s3 = inlined_call_operand.hbm [shape: f32[48,128], index: 3, kind: output, shape index: {}]  }
   0x1   :  { %10 = vsyncpa [#allocation3 + $0x1], 0 }
   0x2   :  { %11 = vsyncpa [#allocation6], 0 }
   0x3   :  { %12 = vsyncpa [#allocation4], 0 }
   0x4   :  { %14 = vsyncpa [#allocation4 + $0x1], 0  ;;  %s714_s12 = smov 0   ;;  %s716_s13 = smov 0  }
   0x5   :  { %s718_s14 = smov 0   ;;  %s720_s15 = smov 0  }
   0x6 LB: > { %s735_s16 = sadd.s32 4294967295, %s683_s15   ;;  %s426_s17 = sadd.s32 4294967294, %s683_s15   ;;  %s683_s15 = sphi %s720_s15, %s941_s15   ;;  %s679_s14 = sphi %s718_s14, %s940_s14   ;;  %s675_s13 = sphi %s716_s13, %s939_s13   ;;  %s671_s12 = sphi %s714_s12, %s938_s12  }
   0x7   : > { %p40_p0 = scmp.ne.s32.totalorder %s675_s13, %s671_s12  ;;  %p923_p1 = scmp.eq.s32.totalorder %s735_s16, 0 }
   0x8   : > { %p112_p3 = scmp.eq.s32.totalorder %s426_s17, 2  ;;  %p427_p5 = scmp.ge.s32.totalorder %s683_s15, 1 }
   0x9   : > { %p744_p4 = por %p923_p1, %p40_p0  ;;  %p119_p7 = scmp.lt.s32.totalorder %s683_s15, 4 }
   0xa   : > { %p749_p6 = por %p112_p3, %p40_p0  ;;  %s685_s21 = smov [#allocation5]  }
   0xb   : > { %s926_s18 = scalar_select %p744_p4, 1, 0 }
   0xc   : > { %s927_s19 = scalar_select %p749_p6, 1, 0 }
   0xd   : > { %p754_p8 = pnand %p427_p5, %p119_p7  ;;  %s131_s22 = sshll.u32 %s685_s21, 4  ;;  %s132_s22 = int_to_ptr.vmem [resolvable:$true] %s131_s22 }
   0xe   : > { %s767_s24 = sadd.s32 1, %s683_s15   ;;  %s27_s25 = sadd.s32 1, %s679_s14 }
   0xf   : > { %s928_s20 = scalar_select %p754_p8, 1, 0 }
  0x10   : > { %p491_p9 = pneg %p754_p8  ;;  %s24_s26 = ssub.s32 %s683_s15, %s767_s24 }
  0x11   : > { %s555_s29 = scalar_lea.hbm %s920_s1, 1024 }
  0x12   : > { %p762_p10 = pnand %p491_p9, %p923_p1  ;;  %p556_p11 = scmp.ne.s32.totalorder %s920_s1, %s555_s29 }
  0x13   : > { %p562_p3 = scmp.lt.u32.totalorder %s555_s29, %s920_s1 }
  0x14   : > { %p557_p12 = pneg %p762_p10 }
  0x16   : > { %p558_p13 = pnand %p557_p12, %p556_p11 }
  0x18   : > { %p559_p0 = pneg %p558_p13 }
  0x1a   : > { %p564_p5 = pnand %p562_p3, %p559_p0 }
  0x1c   : > { %567 = shalt.err (!%p564_p5)
}
  0x1d   : > { %s568_s7 = scalar_lea.vmem %s132_s22, 1024  ;;  %p576_p2 = scmp.lt.s32.totalorder %s132_s22, %s132_s22 }
  0x1e   : > { %p569_p7 = scmp.ne.s32.totalorder %s132_s22, %s568_s7  ;;  %p577_p6 = scmp.lt.s32.totalorder %s568_s7, %s568_s7 }
  0x20   : > { %p571_p9 = pnand %p569_p7, %p557_p12  ;;  %p578_p4 = por %p577_p6, %p576_p2 }
  0x22   : > { %p572_p1 = pneg %p571_p9 }
  0x24   : > { %p579_p8 = pnand %p578_p4, %p572_p1 }
  0x26   : > { %582 = shalt.err (!%p579_p8)
}
  0x27   : > { %s686_s8 = smov 64   ;;  %s687_s9 = smov 4  }
  0x28   : > { %494 = dma.hbm_to_vmem [thread:$0]  (!%p762_p10), %s920_s1, 1024, %s132_s22, [#allocation6], %s686_s8, %s686_s8, %s687_s9  }
  0x29   : > { %p25_p1 = scmp.eq.s32.totalorder %s24_s26, 0  ;;  %p34_p2 = scmp.ne.s32.totalorder %s679_s14, %s675_s13 }
  0x2a   : > { %p35_p4 = scmp.eq.s32.totalorder %s683_s15, 0  ;;  %p504_p6 = scmp.lt.s32.totalorder %s683_s15, 3 }
  0x2b   : > { %s796_s17 = scalar_select %p25_p1, %s679_s14, %s27_s25  }
  0x2c   : > { %p36_p8 = por %p35_p4, %p34_p2  ;;  %p930_p11 = scmp.eq.s32.totalorder %s735_s16, 2 }
  0x2d   : > { %s148_s23 = sand.u32 1, %s679_s14   ;;  %s452_s27 = sshll.u32 %s683_s15, 7 }
  0x2e   : > { %p800_p12 = por %p930_p11, %p34_p2  ;;  %s430_s28 = sshll.u32 %s148_s23, 3 }
  0x2f   : > { %s809_s4 = scalar_lea.hbm %s919_s0, %s452_s27  ;;  %s152_s22 = scalar_lea.vmem [#allocation2], %s430_s28 }
  0x30   : > { %s159_s25 = sshll.u32 %s152_s22, 4  ;;  %p811_p10 = pnand %p504_p6, %p36_p8  ;;  %s815_s25 = int_to_ptr.vmem [resolvable:$true] %s159_s25 }
  0x31   : > { %s817_s5 = scalar_lea.sflag [#allocation3], %s148_s23  ;;  %s583_s6 = scalar_lea.hbm %s809_s4, 128 }
  0x32   : > { %p584_p13 = scmp.ne.s32.totalorder %s809_s4, %s583_s6  ;;  %p585_p0 = pneg %p811_p10 }
  0x33   : > { %s588_s11 = scalar_lea.hbm %s919_s0, 384  ;;  %p589_p7 = scmp.lt.u32.totalorder %s809_s4, %s919_s0 }
  0x34   : > { %p586_p3 = pnand %p585_p0, %p584_p13  ;;  %p590_p9 = scmp.lt.u32.totalorder %s588_s11, %s583_s6 }
  0x35   : > { %p592_p2 = scmp.lt.u32.totalorder %s583_s6, %s809_s4 }
  0x36   : > { %p587_p5 = pneg %p586_p3  ;;  %p591_p1 = por %p590_p9, %p589_p7 }
  0x38   : > { %p593_p4 = por %p592_p2, %p591_p1 }
  0x3a   : > { %p594_p6 = pnand %p593_p4, %p587_p5 }
  0x3c   : > { %597 = shalt.err (!%p594_p6)
}
  0x3d   : > { %s598_s23 = scalar_lea.vmem %s815_s25, 128  ;;  %s688_s29 = smov [#allocation2]  }
  0x3e   : > { %p599_p8 = scmp.ne.s32.totalorder %s815_s25, %s598_s23  ;;  %s603_s30 = sshll.u32 %s688_s29, 4  ;;  %s604_s30 = int_to_ptr.vmem [resolvable:$false] %s603_s30 }
  0x3f   : > { %s605_s22 = scalar_lea.vmem %s604_s30, 256  ;;  %p606_p3 = scmp.lt.s32.totalorder %s815_s25, %s604_s30 }
  0x40   : > { %p601_p11 = pnand %p599_p8, %p585_p0  ;;  %p607_p7 = scmp.lt.s32.totalorder %s605_s22, %s598_s23 }
  0x42   : > { %p602_p13 = pneg %p601_p11  ;;  %p608_p9 = por %p607_p7, %p606_p3 }
  0x44   : > { %p609_p1 = pnand %p608_p9, %p602_p13 }
  0x46   : > { %612 = shalt.err (!%p609_p1)
}
  0x47   : > { %498 = dma.hbm_to_vmem [thread:$0]  (!%p811_p10), %s809_s4, 128, %s815_s25, %s817_s5, %s686_s8, %s686_s8, %s687_s9  }
  0x48   : > { %p933_p0 = scmp.ne.s32.totalorder %s928_s20, 0 }
  0x49   : > { %s851_s6 = sand.u32 (!%p933_p0), 1, %s675_s13   ;;  %p934_p5 = scmp.ne.s32.totalorder (!%p933_p0), %s926_s18, 0 }
  0x4a   : > { %171 = sbr.rel (%p933_p0) target bundleno = 349 (0x15d), region = 32  ;;  %s434_s7 = sshll.u32 (!%p933_p0), %s851_s6, 3 }
  0x4b   : > { %s174_s10 = scalar_lea.sflag (!%p933_p0), [#allocation3], %s851_s6  ;;  %s855_s11 = scalar_lea.vmem (!%p933_p0), [#allocation2], %s434_s7 }
  0x51   : > { %658 = dma.done.wait (%p934_p5), %s174_s10, 128  }
  0x52   : > { %660 = vsyncadd (%p934_p5), %s174_s10, 4294967168  ;;  %p935_p10 = scmp.eq.s32.totalorder %s735_s16, 0 }
  0x54   : > { %662 = dma.done.wait (%p935_p10), [#allocation6], 1024   ;;  %p936_p2 = pmov %p935_p10 }
  0x55   : > { %v689_v0 = vmov 0.0   ;;  %vm690_vm0 = vmmov 0   ;;  %v546_v1 = vld [vmem:[#allocation5] sm:$0xff]   ;;  %v547_v2 = vld [vmem:[#allocation5 + $0x8] sm:$0xff]   ;;  %v548_v3 = vld [vmem:[#allocation5 + $0x10] sm:$0xff]   ;;  %s436_s18 = sshll.u32 %s851_s6, 4 }
  0x56   : > { %664 = vsyncadd (%p936_p2), [#allocation6], 4294966272  ;;  %463 = vmatprep.subr.bf16.mxu0 %v689_v0  ;;  %479 = vmatprep.mubr.msk.bf16.mxu0 %vm690_vm0, %v689_v0  ;;  %v549_v4 = vld [vmem:[#allocation5 + $0x18] sm:$0xff]   ;;  %v550_v5 = vld [vmem:[#allocation5 + $0x20] sm:$0xff]   ;;  %s203_s9 = scalar_lea.vmem [#allocation7], %s436_s18  ;;  %s453_s25 = sshll.u32 %s735_s16, 8 }
  0x57   : > { %464 = vmatpush3.bf16.msra.mxu0 %v546_v1  ;;  %v551_v6 = vld [vmem:[#allocation5 + $0x28] sm:$0xff]   ;;  %v552_v7 = vld [vmem:[#allocation5 + $0x30] sm:$0xff]   ;;  %v553_v8 = vld [vmem:[#allocation5 + $0x38] sm:$0xff]   ;;  %s343_s4 = sshll.u32 %s203_s9, 4  ;;  %s876_s27 = scalar_lea.hbm %s922_s3, %s453_s25  ;;  %s871_s4 = int_to_ptr.vmem [resolvable:$true] %s343_s4 }
  0x58   : > { %465 = vmatprep.subr.bf16.mxu0 %v689_v0  ;;  %v554_v9 = vld [vmem:[%s855_s11] sm:$0xff]   ;;  %s330_s28 = scalar_lea.sflag [#allocation4], %s851_s6  ;;  %s613_s16 = scalar_lea.vmem %s871_s4, 256 }
  0x59   : > { %v437_v10 = vld [vmem:[%s921_s2] ss:$0 sm:$0xff]  ;;  %p614_p4 = scmp.ne.s32.totalorder %s871_s4, %s613_s16  ;;  %s691_s23 = smov [#allocation7]  }
  0x5a   : > { %s617_s29 = sshll.u32 %s691_s23, 4  ;;  %s618_s29 = int_to_ptr.vmem [resolvable:$false] %s617_s29 }
  0x5b   : > { %466 = vmatpush3.bf16.msra.mxu0 %v547_v2  ;;  %p615_p6 = pnand %p614_p4, %p800_p12  ;;  %s619_s30 = scalar_lea.vmem %s618_s29, 512 }
  0x5c   : > { %467 = vmatprep.subr.bf16.mxu0 %v689_v0  ;;  %p620_p11 = scmp.lt.s32.totalorder %s871_s4, %s618_s29  ;;  %p621_p13 = scmp.lt.s32.totalorder %s619_s30, %s613_s16 }
  0x5d   : > { %p616_p8 = pneg %p615_p6 }
  0x5e   : > { %p622_p3 = por %p621_p13, %p620_p11 }
  0x5f   : > { %468 = vmatpush3.bf16.msra.mxu0 %v548_v3 }
  0x60   : > { %469 = vmatprep.subr.bf16.mxu0 %v689_v0  ;;  %p623_p7 = pnand %p622_p3, %p616_p8 }
  0x63   : > { %470 = vmatpush3.bf16.msra.mxu0 %v549_v4 }
  0x64   : > { %471 = vmatprep.subr.bf16.mxu0 %v689_v0 }
  0x67   : > { %472 = vmatpush3.bf16.msra.mxu0 %v550_v5 }
  0x68   : > { %473 = vmatprep.subr.bf16.mxu0 %v689_v0 }
  0x6b   : > { %474 = vmatpush3.bf16.msra.mxu0 %v551_v6 }
  0x6c   : > { %475 = vmatprep.subr.bf16.mxu0 %v689_v0 }
  0x6f   : > { %476 = vmatpush3.bf16.msra.mxu0 %v552_v7 }
  0x70   : > { %477 = vmatprep.subr.bf16.mxu0 %v689_v0 }
  0x73   : > { %478 = vmatpush3.bf16.msra.mxu0 %v553_v8 }
  0x76   : > { %480 = vmatmul.mubr.bf16.vlgmr.msra.gmra.mrb[0].mxu0 %v554_v9 }
 0x149   : > { %v320_v11 = vpop.f32.mrb[0].mxu0 }
 0x14a   : > { %v321_v12 = vadd.f32 %v437_v10, %v320_v11  ;;  %v481_v13 = vpop.f32.mrb[1].mxu0 }
 0x14b   : > { %v323_v14 = vpop.f32.mrb[2].mxu0 }
 0x14c   : > { %327 = vst [vmem:[%s203_s9] sm:$0xff] %v321_v12  ;;  %v324_v15 = vadd.f32 %v437_v10, %v323_v14  ;;  %v482_v16 = vpop.f32.mrb[3].mxu0 }
 0x14e   : > { %328 = vst [vmem:[%s203_s9 + $0x8] sm:$0xff] %v324_v15 }
 0x14f   : > { %626 = shalt.err (!%p623_p7)
}
 0x150   : > { %s627_s22 = scalar_lea.hbm %s876_s27, 256  ;;  %s631_s11 = scalar_lea.hbm %s922_s3, 768 }
 0x151   : > { %p628_p9 = scmp.ne.s32.totalorder %s876_s27, %s627_s22  ;;  %p632_p5 = scmp.lt.u32.totalorder %s876_s27, %s922_s3 }
 0x152   : > { %p633_p10 = scmp.lt.u32.totalorder %s631_s11, %s627_s22  ;;  %p635_p4 = scmp.lt.u32.totalorder %s627_s22, %s876_s27 }
 0x153   : > { %p629_p1 = pnand %p628_p9, %p800_p12 }
 0x154   : > { %p634_p2 = por %p633_p10, %p632_p5 }
 0x155   : > { %p630_p0 = pneg %p629_p1 }
 0x156   : > { %p636_p6 = por %p635_p4, %p634_p2 }
 0x158   : > { %p637_p8 = pnand %p636_p6, %p630_p0 }
 0x15a   : > { %640 = shalt.err (!%p637_p8)
}
 0x15b   : > { %s692_s8 = smov 128   ;;  %s693_s9 = smov 8  }
 0x15c   : > { %489 = dma.vmem_to_hbm [thread:$0]  (%p800_p12), %s871_s4, 256, %s876_s27, %s330_s28, %s692_s8, %s692_s8, %s693_s9  }
 0x15d PF: > { %p506_p11 = scmp.ge.s32.totalorder %s683_s15, 2  ;;  %s358_s25 = sand.u32 1, %s671_s12  }
 0x15e   : > { %p937_p13 = scmp.ne.s32.totalorder %s927_s19, 0  ;;  %s359_s26 = scalar_lea.sflag [#allocation4], %s358_s25 }
 0x160   : > { %p500_p3 = pnand %p506_p11, %p937_p13 }
 0x162   : > { %666 = dma.done.wait (!%p500_p3), %s359_s26, 256  }
 0x163   : > { %668 = vsyncadd (!%p500_p3), %s359_s26, 4294967040  ;;  %p17_p7 = scmp.ge.s32.totalorder %s767_s24, 5   ;;  %s938_s12 = smov %s675_s13 }
 0x164   : > { %s939_s13 = smov %s679_s14  ;;  %s940_s14 = smov %s796_s17 }
 0x165   : > { %s941_s15 = smov %s767_s24  ;;  %19 = sbr.rel (!%p17_p7) target bundleno = 6 (0x6), region = 81 }
 0x16c   :  { %364 = vsyncpa [#allocation3], 1 }
 0x16d   :  { %366 = vsyncpa [#allocation3 + $0x1], 1 }
 0x16e   :  { %367 = vsyncpa [#allocation6], 1 }
 0x16f   :  { %368 = vsyncpa [#allocation4], 1 }
 0x170   :  { %370 = vsyncpa [#allocation4 + $0x1], 1 }

</bundles_post_ra>
